<compile_context>
chip_gen: v7x
topology: tpu7x:2x2x1
jax: 0.10.0
libtpu: 0.0.40
codegen_flags: <defaults>
</compile_context>

<pallas_src>
import math

import jax
import jax.numpy as jnp
from jax.experimental import pallas as pl
from jax.experimental.pallas import tpu as pltpu


def _round_up(x, m):
    return (x + m - 1) // m * m


def _pick_tile_b(padded, max_tile_b):
    """padded is a multiple of 128.  Pick the largest candidate tile that divides
    `padded` exactly (zero extra padding) while leaving >= 2 grid steps whenever
    there is more than one 128-row block (so v7x can use both TensorCores)."""
    if padded <= 128:
        return 128
    for t in (4096, 2048, 1024, 512, 256, 128):
        if t > max_tile_b or padded % t != 0:
            continue
        if padded // t >= 2:
            return t
    return 128


def _emb_block_spec(rows, tile_b, multi_step):
    index_map = lambda i: (0, i)
    if multi_step:
        try:  # 3-deep pipelining on the embedding streams (review: hide DMA jitter)
            return pl.BlockSpec((rows, tile_b), index_map,
                                pipeline_mode=pl.Buffered(3))
        except TypeError:  # older jax without pipeline_mode: fall back to default
            pass
    return pl.BlockSpec((rows, tile_b), index_map)


# ----------------------------------------------------------------------------
# Pallas kernel
# ----------------------------------------------------------------------------
def _make_ncf_kernel(n_hidden_layers, dim_gmf):
    """NCF forward kernel.

    Ref order (activations are [feature, TILE_B] bf16, weights are torch-layout
    [out, in] bf16, biases are [out, 1] bf16):
      user_emb, item_emb,                        # (dg+dm, T): rows [0:dg]=GMF, [dg:]=MLP
      W0_user, W0_item, b0,
      (W_k, b_k) for k = 1 .. n_hidden_layers-1,
      wp_gmf, wp_mlp, b_pred,
      out_ref                                    # (1, T) f32
    """

    def kernel(*refs):
        out_ref = refs[-1]

        ue = refs[0][...]                        # (dg+dm, T) bf16
        ie = refs[1][...]                        # (dg+dm, T) bf16

        # GMF branch on the VPU in f32 (v5e has no bf16 VPU); static row slices
        # at a sublane-aligned offset are free.
        ue_g = ue[:dim_gmf].astype(jnp.float32)  # (dg, T)
        ie_g = ie[:dim_gmf].astype(jnp.float32)
        gmf = ue_g * ie_g

        # MLP branch: bf16 operands straight into the MXU, f32 accumulation.
        ue_m = ue[dim_gmf:]                      # (dm, T) bf16
        ie_m = ie[dim_gmf:]                      # (dm, T) bf16

        # Layer 0 with split-K instead of concatenating ue_m/ie_m.
        idx = 2
        w0u = refs[idx][...]                     # (h0, dm) bf16
        w0i = refs[idx + 1][...]                 # (h0, dm) bf16
        b0 = refs[idx + 2][...].astype(jnp.float32)   # (h0, 1)
        idx += 3
        h = jnp.dot(w0u, ue_m, preferred_element_type=jnp.float32)
        h = h + jnp.dot(w0i, ie_m, preferred_element_type=jnp.float32)
        h = jnp.maximum(h + b0, 0.0)             # bias + ReLU in f32 (dropout = identity)

        for _ in range(n_hidden_layers - 1):
            w = refs[idx][...]                   # (h_out, h_in) bf16
            b = refs[idx + 1][...].astype(jnp.float32)
            idx += 2
            h = jnp.maximum(
                jnp.dot(w, h.astype(jnp.bfloat16),
                        preferred_element_type=jnp.float32) + b,
                0.0,
            )

        # NeuMF head (N=1 output): VPU multiply + sublane (XLU) reduce in f32.
        wp_g = refs[idx][...].astype(jnp.float32)       # (dg, 1)
        wp_m = refs[idx + 1][...].astype(jnp.float32)   # (h_last, 1)
        b_p = refs[idx + 2][...].astype(jnp.float32)    # (1, 1)

        logits = (
            jnp.sum(gmf * wp_g, axis=0, keepdims=True)
            + jnp.sum(h * wp_m, axis=0, keepdims=True)
            + b_p
        )                                               # (1, T) lane-dense

        # Exact sigmoid: this (1, T) slab is negligible work, and the exact divide
        # keeps the output tightly comparable to the f32 reference (the approx EUP
        # reciprocal would be an immeasurable win at one row per tile).
        out_ref[...] = 1.0 / (1.0 + jnp.exp(-logits))

    return kernel


# ----------------------------------------------------------------------------
# Wrapper: XLA gather glue + one tiled pallas_call
# ----------------------------------------------------------------------------
def ncf_forward(user_indices, item_indices, params, *, dim_gmf, max_tile_b=2048):
    batch = user_indices.shape[0]
    padded = _round_up(batch, 128)
    tile_b = _pick_tile_b(padded, max_tile_b)
    grid_steps = padded // tile_b
    pad = padded - batch

    u_idx = jnp.pad(user_indices, (0, pad))
    i_idx = jnp.pad(item_indices, (0, pad))

    # One fused gather per entity -> feature-major (dg+dm, padded_batch) bf16.
    # allow_input_fusion below lets XLA fuse these gather producers into the
    # pallas_call inputs instead of materializing them in HBM first.
    ue = jnp.take(params["user_emb_t"], u_idx, axis=1)
    ie = jnp.take(params["item_emb_t"], i_idx, axis=1)

    d_all = ue.shape[0]
    dm = d_all - dim_gmf

    mlp = params["mlp"]
    n_hidden = len(mlp)

    # Split layer-0 weight along its input dim so the kernel never concatenates.
    w0, b0 = mlp[0]                              # w0: (h0, 2*dm) torch layout
    weight_args = [w0[:, :dm], w0[:, dm:], b0.reshape(-1, 1)]
    for (w, b) in mlp[1:]:
        weight_args += [w, b.reshape(-1, 1)]
    pred_w, pred_b = params["pred_w"], params["pred_b"]   # (1, dg+h_last), (1,)
    weight_args += [
        pred_w[:, :dim_gmf].T,     # (dg, 1)     GMF part of the prediction weight
        pred_w[:, dim_gmf:].T,     # (h_last, 1) MLP part
        pred_b.reshape(1, 1),
    ]

    emb_args = [ue, ie]
    args = emb_args + weight_args

    emb_specs = [_emb_block_spec(d_all, tile_b, grid_steps > 1) for _ in emb_args]
    weight_specs = [pl.BlockSpec(a.shape, lambda i: (0, 0)) for a in weight_args]
    out_spec = pl.BlockSpec((1, tile_b), lambda i: (0, i))

    # Generation-aware VMEM budget: estimate the working set, add margin, and cap
    # at 3/4 of the chip's physical VMEM (64 MiB on v7x, 128 MiB on v5e/v6e).
    max_hidden = max(w.shape[0] for (w, _) in mlp)
    buffers = 3 if grid_steps > 1 else 2
    emb_bytes = buffers * 2 * d_all * tile_b * 2             # 2 bf16 input streams
    out_bytes = 2 * tile_b * 4                                # double-buffered f32 out
    weight_bytes = 2 * sum(int(a.size) * a.dtype.itemsize for a in weight_args)
    f32_work = 4 * tile_b * (3 * dim_gmf + 2 * dm + 3 * max_hidden + 8)
    vmem_est = emb_bytes + out_bytes + weight_bytes + f32_work
    try:
        vmem_cap = int(pltpu.get_tpu_info().vmem_capacity_bytes)
    except Exception:
        vmem_cap = 64 << 20                                   # conservative (v7x per-TC)
    vmem_limit = max(16 << 20, min(vmem_est + (4 << 20), (vmem_cap * 3) // 4))

    cp_kwargs = dict(dimension_semantics=("parallel",), vmem_limit_bytes=vmem_limit)
    try:
        compiler_params = pltpu.CompilerParams(
            allow_input_fusion=[True] * len(emb_args) + [False] * len(weight_args),
            **cp_kwargs,
        )
    except TypeError:      # older jax without allow_input_fusion
        compiler_params = pltpu.CompilerParams(**cp_kwargs)

    out = pl.pallas_call(
        _make_ncf_kernel(n_hidden, dim_gmf),
        out_shape=jax.ShapeDtypeStruct((1, padded), jnp.float32),
        grid=(grid_steps,),
        in_specs=emb_specs + weight_specs,
        out_specs=out_spec,
        compiler_params=compiler_params,
    )(*args)

    # matches torch: prediction.squeeze()
    return jnp.squeeze(out[0, :batch])


# ----------------------------------------------------------------------------
# Deterministic parameter initialization (mirrors the module's _init_weights)
# ----------------------------------------------------------------------------
def init_params(key, num_users, num_items, dim_gmf, dim_mlp, mlp_hidden_layers,
                param_dtype=jnp.bfloat16):
    keys = jax.random.split(key, 5 + len(mlp_hidden_layers))

    def xavier_uniform(k, fan_out, fan_in):
        bound = math.sqrt(6.0 / (fan_in + fan_out))
        w = jax.random.uniform(k, (fan_out, fan_in), jnp.float32,
                               minval=-bound, maxval=bound)
        return w.astype(param_dtype)   # torch nn.Linear layout: [out, in]

    def emb_t(k, n, d):
        # nn.Embedding weight ~ N(0, 0.01^2), stored TRANSPOSED [dim, num] so a
        # column gather yields feature-major [dim, batch] activations.
        return (0.01 * jax.random.normal(k, (d, n), jnp.float32)).astype(param_dtype)

    # Fused per-entity tables: rows [0:dg] = GMF embedding, rows [dg:] = MLP embedding.
    params = {
        "user_emb_t": jnp.concatenate(
            [emb_t(keys[0], num_users, dim_gmf), emb_t(keys[2], num_users, dim_mlp)],
            axis=0),
        "item_emb_t": jnp.concatenate(
            [emb_t(keys[1], num_items, dim_gmf), emb_t(keys[3], num_items, dim_mlp)],
            axis=0),
    }

    mlp = []
    in_size = dim_mlp * 2
    for i, h in enumerate(mlp_hidden_layers):
        w = xavier_uniform(keys[4 + i], h, in_size)     # [out, in]
        b = jnp.zeros((h,), param_dtype)
        mlp.append((w, b))
        in_size = h
    params["mlp"] = mlp

    pred_in = dim_gmf + mlp_hidden_layers[-1]
    params["pred_w"] = xavier_uniform(keys[4 + len(mlp_hidden_layers)], 1, pred_in)
    params["pred_b"] = jnp.zeros((1,), param_dtype)
    return params


# ----------------------------------------------------------------------------
# Pure-JAX reference (same bf16-stored params, f32 compute)
# ----------------------------------------------------------------------------
def ncf_reference(user_indices, item_indices, params, *, dim_gmf):
    p = jax.tree_util.tree_map(lambda a: a.astype(jnp.float32), params)
    ue = jnp.take(p["user_emb_t"], user_indices, axis=1)   # (dg+dm, B)
    ie = jnp.take(p["item_emb_t"], item_indices, axis=1)
    ue_g, ue_m = ue[:dim_gmf].T, ue[dim_gmf:].T
    ie_g, ie_m = ie[:dim_gmf].T, ie[dim_gmf:].T

    gmf = ue_g * ie_g
    x = jnp.concatenate([ue_m, ie_m], axis=-1)
    for (w, b) in p["mlp"]:
        x = jnp.maximum(x @ w.T + b, 0.0)
    z = jnp.concatenate([gmf, x], axis=-1)
    logits = z @ p["pred_w"].T + p["pred_b"]
    return jnp.squeeze(jax.nn.sigmoid(logits), axis=-1)


# ----------------------------------------------------------------------------
if __name__ == "__main__":
    # Small, module-consistent config.
    num_users = 32
    num_items = 48
    embedding_dim_gmf = 16
    embedding_dim_mlp = 32
    mlp_hidden_layers = [64, 32, 16]
    dropout_rate = 0.2   # identity at inference time
    batch_sizes = (8, 300)   # single-tile path and multi-tile (grid=3) path

    key = jax.random.PRNGKey(0)
    k_param, k_u, k_i = jax.random.split(key, 3)

    params = init_params(
        k_param, num_users, num_items, embedding_dim_gmf, embedding_dim_mlp,
        mlp_hidden_layers,
    )

    for batch in batch_sizes:
        ku = jax.random.fold_in(k_u, batch)
        ki = jax.random.fold_in(k_i, batch)
        user_indices = jax.random.randint(ku, (batch,), 0, num_users, dtype=jnp.int32)
        item_indices = jax.random.randint(ki, (batch,), 0, num_items, dtype=jnp.int32)

        out = ncf_forward(user_indices, item_indices, params,
                          dim_gmf=embedding_dim_gmf)
        out = jax.block_until_ready(out)

        ref = ncf_reference(user_indices, item_indices, params,
                            dim_gmf=embedding_dim_gmf)
        assert out.shape == (batch,), (batch, out.shape)
        assert jnp.allclose(out, ref, atol=1e-3, rtol=1e-3), (batch, out, ref)

    print("KERNEL_OK")
</pallas_src>

<mosaic_0001>
module attributes {stable_mosaic.version = 11 : i64} {
  func.func @kernel(%arg0: i32, %arg1: memref<48x128xbf16, #tpu.memory_space<vmem>>, %arg2: memref<48x128xbf16, #tpu.memory_space<vmem>>, %arg3: memref<64x32xbf16, #tpu.memory_space<vmem>>, %arg4: memref<64x32xbf16, #tpu.memory_space<vmem>>, %arg5: memref<64x1xbf16, #tpu.memory_space<vmem>>, %arg6: memref<32x64xbf16, #tpu.memory_space<vmem>>, %arg7: memref<32x1xbf16, #tpu.memory_space<vmem>>, %arg8: memref<16x32xbf16, #tpu.memory_space<vmem>>, %arg9: memref<16x1xbf16, #tpu.memory_space<vmem>>, %arg10: memref<16x1xbf16, #tpu.memory_space<vmem>>, %arg11: memref<16x1xbf16, #tpu.memory_space<vmem>>, %arg12: memref<1x1xbf16, #tpu.memory_space<vmem>>, %arg13: memref<1x128xf32, #tpu.memory_space<vmem>>) attributes {dimension_semantics = [#tpu.dimension_semantics<parallel>], iteration_bounds = array<i64: 1>, scalar_prefetch = 0 : i64, scratch_operands = 0 : i64, tpu.core_type = #tpu.core_type<tc>, window_params = [{transform_indices = @transform_0, window_bounds = array<i64: 48, 128>}, {transform_indices = @transform_1, window_bounds = array<i64: 48, 128>}, {pipeline_mode = #tpu.pipeline_mode<synchronous>, transform_indices = @transform_2, window_bounds = array<i64: 64, 32>}, {pipeline_mode = #tpu.pipeline_mode<synchronous>, transform_indices = @transform_3, window_bounds = array<i64: 64, 32>}, {pipeline_mode = #tpu.pipeline_mode<synchronous>, transform_indices = @transform_4, window_bounds = array<i64: 64, 1>}, {pipeline_mode = #tpu.pipeline_mode<synchronous>, transform_indices = @transform_5, window_bounds = array<i64: 32, 64>}, {pipeline_mode = #tpu.pipeline_mode<synchronous>, transform_indices = @transform_6, window_bounds = array<i64: 32, 1>}, {pipeline_mode = #tpu.pipeline_mode<synchronous>, transform_indices = @transform_7, window_bounds = array<i64: 16, 32>}, {pipeline_mode = #tpu.pipeline_mode<synchronous>, transform_indices = @transform_8, window_bounds = array<i64: 16, 1>}, {pipeline_mode = #tpu.pipeline_mode<synchronous>, transform_indices = @transform_9, window_bounds = array<i64: 16, 1>}, {pipeline_mode = #tpu.pipeline_mode<synchronous>, transform_indices = @transform_10, window_bounds = array<i64: 16, 1>}, {pipeline_mode = #tpu.pipeline_mode<synchronous>, transform_indices = @transform_11, window_bounds = array<i64: 1, 1>}, {transform_indices = @transform_12, window_bounds = array<i64: 1, 128>}]} {
    %c0 = arith.constant 0 : index
    %c0_0 = arith.constant 0 : index
    %0 = vector.load %arg1[%c0, %c0_0] : memref<48x128xbf16, #tpu.memory_space<vmem>>, vector<48x128xbf16>
    %c0_1 = arith.constant 0 : index
    %c0_2 = arith.constant 0 : index
    %1 = vector.load %arg2[%c0_1, %c0_2] : memref<48x128xbf16, #tpu.memory_space<vmem>>, vector<48x128xbf16>
    %2 = vector.extract_strided_slice %0 {offsets = [0, 0], sizes = [16, 128], strides = [1, 1]} : vector<48x128xbf16> to vector<16x128xbf16>
    %3 = arith.extf %2 : vector<16x128xbf16> to vector<16x128xf32>
    %4 = vector.extract_strided_slice %1 {offsets = [0, 0], sizes = [16, 128], strides = [1, 1]} : vector<48x128xbf16> to vector<16x128xbf16>
    %5 = arith.extf %4 : vector<16x128xbf16> to vector<16x128xf32>
    %6 = arith.mulf %3, %5 : vector<16x128xf32>
    %7 = vector.extract_strided_slice %0 {offsets = [16, 0], sizes = [32, 128], strides = [1, 1]} : vector<48x128xbf16> to vector<32x128xbf16>
    %8 = vector.extract_strided_slice %1 {offsets = [16, 0], sizes = [32, 128], strides = [1, 1]} : vector<48x128xbf16> to vector<32x128xbf16>
    %c0_3 = arith.constant 0 : index
    %c0_4 = arith.constant 0 : index
    %9 = vector.load %arg3[%c0_3, %c0_4] : memref<64x32xbf16, #tpu.memory_space<vmem>>, vector<64x32xbf16>
    %c0_5 = arith.constant 0 : index
    %c0_6 = arith.constant 0 : index
    %10 = vector.load %arg4[%c0_5, %c0_6] : memref<64x32xbf16, #tpu.memory_space<vmem>>, vector<64x32xbf16>
    %c0_7 = arith.constant 0 : index
    %c0_8 = arith.constant 0 : index
    %11 = vector.load %arg5[%c0_7, %c0_8] : memref<64x1xbf16, #tpu.memory_space<vmem>>, vector<64x1xbf16>
    %12 = arith.extf %11 : vector<64x1xbf16> to vector<64x1xf32>
    %cst = arith.constant dense<0.000000e+00> : vector<64x128xf32>
    %13 = tpu.matmul %9, %7, %cst {dimension_numbers = #tpu.dot_dimension_numbers<[1], [0], [0], [1], [0, 0, 1, 1], [], []>} : vector<64x32xbf16>, vector<32x128xbf16>, vector<64x128xf32> -> vector<64x128xf32>
    %cst_9 = arith.constant dense<0.000000e+00> : vector<64x128xf32>
    %14 = tpu.matmul %10, %8, %cst_9 {dimension_numbers = #tpu.dot_dimension_numbers<[1], [0], [0], [1], [0, 0, 1, 1], [], []>} : vector<64x32xbf16>, vector<32x128xbf16>, vector<64x128xf32> -> vector<64x128xf32>
    %15 = arith.addf %13, %14 : vector<64x128xf32>
    %16 = vector.broadcast %12 : vector<64x1xf32> to vector<64x128xf32>
    %17 = arith.addf %15, %16 : vector<64x128xf32>
    %cst_10 = arith.constant 0.000000e+00 : f32
    %18 = vector.broadcast %cst_10 : f32 to vector<64x128xf32>
    %19 = arith.maximumf %17, %18 : vector<64x128xf32>
    %c0_11 = arith.constant 0 : index
    %c0_12 = arith.constant 0 : index
    %20 = vector.load %arg6[%c0_11, %c0_12] : memref<32x64xbf16, #tpu.memory_space<vmem>>, vector<32x64xbf16>
    %c0_13 = arith.constant 0 : index
    %c0_14 = arith.constant 0 : index
    %21 = vector.load %arg7[%c0_13, %c0_14] : memref<32x1xbf16, #tpu.memory_space<vmem>>, vector<32x1xbf16>
    %22 = arith.extf %21 : vector<32x1xbf16> to vector<32x1xf32>
    %23 = arith.truncf %19 : vector<64x128xf32> to vector<64x128xbf16>
    %cst_15 = arith.constant dense<0.000000e+00> : vector<32x128xf32>
    %24 = tpu.matmul %20, %23, %cst_15 {dimension_numbers = #tpu.dot_dimension_numbers<[1], [0], [0], [1], [0, 0, 1, 1], [], []>} : vector<32x64xbf16>, vector<64x128xbf16>, vector<32x128xf32> -> vector<32x128xf32>
    %25 = vector.broadcast %22 : vector<32x1xf32> to vector<32x128xf32>
    %26 = arith.addf %24, %25 : vector<32x128xf32>
    %cst_16 = arith.constant 0.000000e+00 : f32
    %27 = vector.broadcast %cst_16 : f32 to vector<32x128xf32>
    %28 = arith.maximumf %26, %27 : vector<32x128xf32>
    %c0_17 = arith.constant 0 : index
    %c0_18 = arith.constant 0 : index
    %29 = vector.load %arg8[%c0_17, %c0_18] : memref<16x32xbf16, #tpu.memory_space<vmem>>, vector<16x32xbf16>
    %c0_19 = arith.constant 0 : index
    %c0_20 = arith.constant 0 : index
    %30 = vector.load %arg9[%c0_19, %c0_20] : memref<16x1xbf16, #tpu.memory_space<vmem>>, vector<16x1xbf16>
    %31 = arith.extf %30 : vector<16x1xbf16> to vector<16x1xf32>
    %32 = arith.truncf %28 : vector<32x128xf32> to vector<32x128xbf16>
    %cst_21 = arith.constant dense<0.000000e+00> : vector<16x128xf32>
    %33 = tpu.matmul %29, %32, %cst_21 {dimension_numbers = #tpu.dot_dimension_numbers<[1], [0], [0], [1], [0, 0, 1, 1], [], []>} : vector<16x32xbf16>, vector<32x128xbf16>, vector<16x128xf32> -> vector<16x128xf32>
    %34 = vector.broadcast %31 : vector<16x1xf32> to vector<16x128xf32>
    %35 = arith.addf %33, %34 : vector<16x128xf32>
    %cst_22 = arith.constant 0.000000e+00 : f32
    %36 = vector.broadcast %cst_22 : f32 to vector<16x128xf32>
    %37 = arith.maximumf %35, %36 : vector<16x128xf32>
    %c0_23 = arith.constant 0 : index
    %c0_24 = arith.constant 0 : index
    %38 = vector.load %arg10[%c0_23, %c0_24] : memref<16x1xbf16, #tpu.memory_space<vmem>>, vector<16x1xbf16>
    %39 = arith.extf %38 : vector<16x1xbf16> to vector<16x1xf32>
    %c0_25 = arith.constant 0 : index
    %c0_26 = arith.constant 0 : index
    %40 = vector.load %arg11[%c0_25, %c0_26] : memref<16x1xbf16, #tpu.memory_space<vmem>>, vector<16x1xbf16>
    %41 = arith.extf %40 : vector<16x1xbf16> to vector<16x1xf32>
    %c0_27 = arith.constant 0 : index
    %c0_28 = arith.constant 0 : index
    %42 = vector.load %arg12[%c0_27, %c0_28] : memref<1x1xbf16, #tpu.memory_space<vmem>>, vector<1x1xbf16>
    %43 = arith.extf %42 : vector<1x1xbf16> to vector<1x1xf32>
    %44 = vector.broadcast %39 : vector<16x1xf32> to vector<16x128xf32>
    %45 = arith.mulf %6, %44 : vector<16x128xf32>
    %cst_29 = arith.constant dense<0.000000e+00> : vector<128xf32>
    %46 = vector.multi_reduction <add>, %45, %cst_29 [0] : vector<16x128xf32> to vector<128xf32>
    %47 = vector.shape_cast %46 : vector<128xf32> to vector<1x128xf32>
    %48 = vector.broadcast %41 : vector<16x1xf32> to vector<16x128xf32>
    %49 = arith.mulf %37, %48 : vector<16x128xf32>
    %cst_30 = arith.constant dense<0.000000e+00> : vector<128xf32>
    %50 = vector.multi_reduction <add>, %49, %cst_30 [0] : vector<16x128xf32> to vector<128xf32>
    %51 = vector.shape_cast %50 : vector<128xf32> to vector<1x128xf32>
    %52 = arith.addf %47, %51 : vector<1x128xf32>
    %53 = vector.broadcast %43 : vector<1x1xf32> to vector<1x128xf32>
    %54 = arith.addf %52, %53 : vector<1x128xf32>
    %cst_31 = arith.constant 0.000000e+00 : f32
    %55 = vector.broadcast %cst_31 : f32 to vector<1x128xf32>
    %56 = arith.subf %55, %54 : vector<1x128xf32>
    %57 = math.exp %56 : vector<1x128xf32>
    %cst_32 = arith.constant 1.000000e+00 : f32
    %58 = vector.broadcast %cst_32 : f32 to vector<1x128xf32>
    %59 = arith.addf %58, %57 : vector<1x128xf32>
    %cst_33 = arith.constant 1.000000e+00 : f32
    %60 = vector.broadcast %cst_33 : f32 to vector<1x128xf32>
    %61 = arith.divf %60, %59 : vector<1x128xf32>
    %c0_34 = arith.constant 0 : index
    %c0_35 = arith.constant 0 : index
    %62 = vector.load %arg13[%c0_34, %c0_35] : memref<1x128xf32, #tpu.memory_space<vmem>>, vector<1x128xf32>
    tpu.vector_store %arg13[%c0_34, %c0_35], %61 {strides = array<i32>} : memref<1x128xf32, #tpu.memory_space<vmem>>, vector<1x128xf32>,
    return
  }
  func.func @transform_0(%arg0: i32) -> (i32, i32) {
    %c0_i32 = arith.constant 0 : i32
    %c0_i32_0 = arith.constant 0 : i32
    return %c0_i32, %arg0 : i32, i32
  }
  func.func @transform_1(%arg0: i32) -> (i32, i32) {
    %c0_i32 = arith.constant 0 : i32
    %c0_i32_0 = arith.constant 0 : i32
    return %c0_i32, %arg0 : i32, i32
  }
  func.func @transform_2(%arg0: i32) -> (i32, i32) {
    %c0_i32 = arith.constant 0 : i32
    %c0_i32_0 = arith.constant 0 : i32
    %c0_i32_1 = arith.constant 0 : i32
    return %c0_i32, %c0_i32_0 : i32, i32
  }
  func.func @transform_3(%arg0: i32) -> (i32, i32) {
    %c0_i32 = arith.constant 0 : i32
    %c0_i32_0 = arith.constant 0 : i32
    %c0_i32_1 = arith.constant 0 : i32
    return %c0_i32, %c0_i32_0 : i32, i32
  }
  func.func @transform_4(%arg0: i32) -> (i32, i32) {
    %c0_i32 = arith.constant 0 : i32
    %c0_i32_0 = arith.constant 0 : i32
    %c0_i32_1 = arith.constant 0 : i32
    return %c0_i32, %c0_i32_0 : i32, i32
  }
  func.func @transform_5(%arg0: i32) -> (i32, i32) {
    %c0_i32 = arith.constant 0 : i32
    %c0_i32_0 = arith.constant 0 : i32
    %c0_i32_1 = arith.constant 0 : i32
    return %c0_i32, %c0_i32_0 : i32, i32
  }
  func.func @transform_6(%arg0: i32) -> (i32, i32) {
    %c0_i32 = arith.constant 0 : i32
    %c0_i32_0 = arith.constant 0 : i32
    %c0_i32_1 = arith.constant 0 : i32
    return %c0_i32, %c0_i32_0 : i32, i32
  }
  func.func @transform_7(%arg0: i32) -> (i32, i32) {
    %c0_i32 = arith.constant 0 : i32
    %c0_i32_0 = arith.constant 0 : i32
    %c0_i32_1 = arith.constant 0 : i32
    return %c0_i32, %c0_i32_0 : i32, i32
  }
  func.func @transform_8(%arg0: i32) -> (i32, i32) {
    %c0_i32 = arith.constant 0 : i32
    %c0_i32_0 = arith.constant 0 : i32
    %c0_i32_1 = arith.constant 0 : i32
    return %c0_i32, %c0_i32_0 : i32, i32
  }
  func.func @transform_9(%arg0: i32) -> (i32, i32) {
    %c0_i32 = arith.constant 0 : i32
    %c0_i32_0 = arith.constant 0 : i32
    %c0_i32_1 = arith.constant 0 : i32
    return %c0_i32, %c0_i32_0 : i32, i32
  }
  func.func @transform_10(%arg0: i32) -> (i32, i32) {
    %c0_i32 = arith.constant 0 : i32
    %c0_i32_0 = arith.constant 0 : i32
    %c0_i32_1 = arith.constant 0 : i32
    return %c0_i32, %c0_i32_0 : i32, i32
  }
  func.func @transform_11(%arg0: i32) -> (i32, i32) {
    %c0_i32 = arith.constant 0 : i32
    %c0_i32_0 = arith.constant 0 : i32
    %c0_i32_1 = arith.constant 0 : i32
    return %c0_i32, %c0_i32_0 : i32, i32
  }
  func.func @transform_12(%arg0: i32) -> (i32, i32) {
    %c0_i32 = arith.constant 0 : i32
    %c0_i32_0 = arith.constant 0 : i32
    return %c0_i32, %arg0 : i32, i32
  }
}

</mosaic_0001>

<bundles_post_ra>
// kernel: tpu_custom_call.1
= control target key start
LH: loop header
LB: loop body
LE: loop exit
PB: predicated region body
PF: predicated region fallthrough
CT: control target
= control target key end

     0   :  { %s1058_s0 = inlined_call_operand.vmem [shape: bf16[48,128], index: 0, kind: input, shape index: {}]   ;;  %s1059_s1 = inlined_call_operand.vmem [shape: bf16[48,128], index: 1, kind: input, shape index: {}]   ;;  %s1060_s2 = inlined_call_operand.vmem [shape: bf16[64,32], index: 2, kind: input, shape index: {}]   ;;  %s1061_s3 = inlined_call_operand.vmem [shape: bf16[64,32], index: 3, kind: input, shape index: {}]   ;;  %s1062_s4 = inlined_call_operand.vmem [shape: bf16[64,1], index: 4, kind: input, shape index: {}]   ;;  %s1063_s5 = inlined_call_operand.vmem [shape: bf16[32,64], index: 5, kind: input, shape index: {}]   ;;  %s1064_s6 = inlined_call_operand.vmem [shape: bf16[32,1], index: 6, kind: input, shape index: {}]   ;;  %s1065_s7 = inlined_call_operand.vmem [shape: bf16[16,32], index: 7, kind: input, shape index: {}]   ;;  %s1066_s8 = inlined_call_operand.vmem [shape: bf16[16,1], index: 8, kind: input, shape index: {}]   ;;  %s1067_s9 = inlined_call_operand.vmem [shape: bf16[16,1], index: 9, kind: input, shape index: {}]   ;;  %s1068_s10 = inlined_call_operand.vmem [shape: bf16[16,1], index: 10, kind: input, shape index: {}]   ;;  %s1069_s11 = inlined_call_operand.<no memory space> [shape: bf16[1,1], index: 11, kind: input, shape index: {}]   ;;  %s1070_s12 = inlined_call_operand.hbm [shape: f32[1,128], index: 12, kind: output, shape index: {}]  }
   0x1   :  { %v17_v0 = vstv %s1069_s11 }
   0x2   :  { %18 = vst [vmem:[#allocation2] sm:$0x1] %v17_v0 }
   0x3   :  { %v827_v1 = vld [vmem:[%s1059_s1 + $0x8] sm:$0xff]   ;;  %vm127_vm0 = vcmask 261120   ;;  %v828_v2 = vld [vmem:[%s1059_s1 + $0x10] sm:$0xff]   ;;  %v829_v3 = vld [vmem:[%s1061_s3] sm:$0xff]   ;;  %v884_v4 = vmov 0  }
   0x4   :  { %723 = vmatprep.subr.bf16.mxu0 %v827_v1  ;;  %780 = vset.pattern.permute.xlu0 %v884_v4  ;;  %v831_v5 = vld [vmem:[%s1058_s0 + $0x8] sm:$0xff]   ;;  %v832_v7 = vld [vmem:[%s1061_s3 + $0x10] sm:$0xff]   ;;  %v663_v9 = vld [vmem:[%s1062_s4] sm:$0xff]  }
   0x5   :  { %724 = vmatpush3.bf16.msra.mxu0 %v827_v1  ;;  %791 = vset.pattern.permute.xlu1 %v884_v4  ;;  %v830_v6 = vld [vmem:[%s1061_s3 + $0x8] sm:$0xff]   ;;  %v834_v8 = vld [vmem:[%s1058_s0 + $0x10] sm:$0xff]   ;;  %v664_v12 = vunpack.c.l.bf16 %v663_v9  ;;  %v665_v13 = vunpack.c.h.bf16 %v663_v9  ;;  %v700_v16 = vld [vmem:[%s1062_s4 + $0x18] sm:$0xff]  }
   0x6   :  { %725 = vmatprep.subr.bf16.mxu0 %v828_v2  ;;  %727 = vmatprep.mubr.msk.bf16.mxu0 %vm127_vm0, %v829_v3  ;;  %v698_v10 = vld [vmem:[%s1062_s4 + $0x8] sm:$0xff]   ;;  %v699_v11 = vld [vmem:[%s1062_s4 + $0x10] sm:$0xff]   ;;  %v833_v17 = vld [vmem:[%s1061_s3 + $0x18] sm:$0xff]   ;;  %v676_v23 = vunpack.c.l.bf16 %v700_v16  ;;  %v677_v24 = vunpack.c.h.bf16 %v700_v16 }
   0x7   :  { %v668_v14 = vunpack.c.l.bf16 %v698_v10  ;;  %v669_v15 = vunpack.c.h.bf16 %v698_v10  ;;  %v835_v18 = vld [vmem:[%s1060_s2] sm:$0xff]   ;;  %v672_v19 = vunpack.c.l.bf16 %v699_v11  ;;  %v673_v20 = vunpack.c.h.bf16 %v699_v11  ;;  %v701_v25 = vld [vmem:[%s1064_s6 + $0x8] sm:$0xff]  }
   0x8   :  { %v679_v21 = vld [vmem:[%s1064_s6] sm:$0xff]   ;;  %v781_v22 = vpack.i.bf16 %v665_v13, %v664_v12 }
   0x9   :  { %726 = vmatpush3.bf16.msra.mxu0 %v828_v2  ;;  %v792_v26 = vpack.i.bf16 %v673_v20, %v672_v19  ;;  %v786_v27 = vpack.i.bf16 %v669_v15, %v668_v14  ;;  %v680_v28 = vunpack.c.l.bf16 %v679_v21  ;;  %v681_v29 = vunpack.c.h.bf16 %v679_v21 }
   0xa   :  { %735 = vmatprep.subr.bf16.mxu0 %v831_v5  ;;  %782 = vperm.xlu0 %780, %v781_v22  }
   0xc   :  { %728 = vmatmul.mubr.msk.bf16.vlgmr.msra.gmra.mrb[0].mxu0 %vm127_vm0, %v830_v6 }
   0xd   :  { %736 = vmatpush3.bf16.msra.mxu0 %v831_v5  ;;  %731 = vmatprep.mubr.msk.bf16.mxu0 %vm127_vm0, %v832_v7 }
   0xe   :  { %737 = vmatprep.subr.bf16.mxu0 %v834_v8 }
  0x11   :  { %738 = vmatpush3.bf16.msra.mxu0 %v834_v8 }
  0x12   :  { %19 = vsyncpa [#allocation4], 0  ;;  %793 = vperm.xlu1 %791, %v792_v26   ;;  %v797_v30 = vpack.i.bf16 %v677_v24, %v676_v23  ;;  %v687_v31 = vld [vmem:[%s1066_s8] sm:$0xff]   ;;  %v684_v32 = vunpack.c.l.bf16 %v701_v25  ;;  %v685_v33 = vunpack.c.h.bf16 %v701_v25  ;;  %787 = vperm.xlu0 %780, %v786_v27   ;;  %v802_v35 = vpack.i.bf16 %v681_v29, %v680_v28  ;;  %v836_v38 = vld [vmem:[%s1060_s2 + $0x8] sm:$0xff]  }
  0x13   :  { %v691_v34 = vld [vmem:[%s1067_s9] sm:$0xff]   ;;  %v688_v36 = vunpack.c.l.bf16 %v687_v31  ;;  %v689_v37 = vunpack.c.h.bf16 %v687_v31  ;;  %v837_v43 = vld [vmem:[%s1060_s2 + $0x10] sm:$0xff]   ;;  %v838_v50 = vld [vmem:[%s1060_s2 + $0x18] sm:$0xff]   ;;  %vm416_vm1 = vcmask 523264   ;;  %v885_v22 = vmov 0.0  }
  0x14   :  { %732 = vmatmul.mubr.msk.bf16.gmra.mrb[4].mxu0 %vm127_vm0, %v833_v17  ;;  %v807_v39 = vpack.i.bf16 %v685_v33, %v684_v32  ;;  %v695_v40 = vld [vmem:[%s1068_s10] sm:$0xff]   ;;  %v692_v41 = vunpack.c.l.bf16 %v691_v34  ;;  %v693_v42 = vunpack.c.h.bf16 %v691_v34  ;;  %v840_v21 = vld [vmem:[%s1063_s5 + $0x8] sm:$0xff]   ;;  %vm886_vm2 = vmmov 0  }
  0x15   :  { %739 = vmatprep.mubr.msk.bf16.mxu0 %vm127_vm0, %v835_v18  ;;  %v812_v44 = vpack.i.bf16 %v689_v37, %v688_v36  ;;  %v696_v45 = vunpack.c.l.bf16 %v695_v40  ;;  %v697_v46 = vunpack.c.h.bf16 %v695_v40  ;;  %v553_v48 = vld [vmem:[#allocation2] sm:$0x1] }
  0x16   :  { %798 = vperm.xlu1 %791, %v797_v30   ;;  %803 = vperm.xlu0 %780, %v802_v35   ;;  %v817_v47 = vpack.i.bf16 %v693_v42, %v692_v41  ;;  %v554_v51 = vunpack.c.l.bf16 %v553_v48  ;;  %v839_v52 = vld [vmem:[%s1063_s5] sm:$0xff]  }
  0x17   :  { %v822_v49 = vpack.i.bf16 %v697_v46, %v696_v45  ;;  %755 = vmatprep.mubr.msk.bf16.mxu1 %vm416_vm1, %v839_v52  ;;  %v655_v40 = vld [vmem:[%s1058_s0] sm:$0xff]   ;;  %s888_s0 = smov [#allocation3]  }
  0x18   :  { %v659_v41 = vld [vmem:[%s1059_s1] sm:$0xff]   ;;  %v656_v42 = vunpack.c.l.bf16 %v655_v40  ;;  %s620_s1 = sshll.u32 %s888_s0, 4  ;;  %s621_s1 = int_to_ptr.vmem [resolvable:$true] %s620_s1 }
  0x19   :  { %v661_v45 = vunpack.c.h.bf16 %v659_v41  ;;  %s864_s11 = scalar_lea.vmem %s621_s1, 32  ;;  %p865_p1 = scmp.lt.s32.totalorder %s621_s1, %s621_s1 }
  0x1a   :  { %808 = vperm.xlu1 %791, %v807_v39   ;;  %813 = vperm.xlu0 %780, %v812_v44   ;;  %v841_v39 = vld [vmem:[%s1065_s7] sm:$0xff]   ;;  %v660_v44 = vunpack.c.l.bf16 %v659_v41  ;;  %s860_s7 = scalar_lea.vmem %s621_s1, 16 }
  0x1b   :  { %p861_p0 = scmp.ne.s32.totalorder %s621_s1, %s860_s7  ;;  %p866_p2 = scmp.lt.s32.totalorder %s864_s11, %s860_s7 }
  0x1c   :  { %740 = vmatmul.mubr.msk.bf16.vlgmr.msra.gmra.mrb[0].mxu0 %vm127_vm0, %v836_v38 }
  0x1d   :  { %743 = vmatprep.mubr.msk.bf16.mxu0 %vm127_vm0, %v837_v43  ;;  %v657_v43 = vunpack.c.h.bf16 %v655_v40  ;;  %p867_p3 = por %p866_p2, %p865_p1 }
  0x1e   :  { %818 = vperm.xlu1 %791, %v817_v47   ;;  %823 = vperm.xlu0 %780, %v822_v49   ;;  %v61_v49 = vmul.f32 %v660_v44, %v656_v42 }
  0x1f   :  { %p868_p4 = pnand %p867_p3, %p861_p0 }
  0x22   :  { %596 = vperm.xlu1 %791, %v554_v51  }
  0x24   :  { %744 = vmatmul.mubr.msk.bf16.gmra.mrb[4].mxu0 %vm127_vm0, %v838_v50  ;;  %v62_v50 = vmul.f32 %v661_v45, %v657_v43 }
  0x89   :  { %v783_v53 = vpop.permute.xlu0 %782 }
  0x91   :  { %v788_v54 = vpop.permute.xlu0 %787  ;;  %v794_v55 = vpop.permute.xlu1 %793 }
  0x95   :  { %v799_v63 = vpop.permute.xlu1 %798  ;;  %v804_v24 = vpop.permute.xlu0 %803 }
  0x99   :  { %v809_v23 = vpop.permute.xlu1 %808 }
  0x9d   :  { %v819_v46 = vpop.permute.xlu1 %818 }
  0x9e   :  { %v821_v47 = vunpack.i.h.bf16 %v819_v46  ;;  %v820_v48 = vunpack.i.l.bf16 %v819_v46 }
  0xa0   :  { %v565_v51 = vmul.f32 %v820_v48, %v61_v49  ;;  %v566_v52 = vmul.f32 %v821_v47, %v62_v50 }
  0xef   :  { %v741_v56 = vpop.f32.mrb[0].mxu0 }
  0xf0   :  { %v846_v57 = vadd.low.f32.bf16 %v741_v56, %v788_v54  ;;  %v283_v58 = vpop.f32.mrb[1].mxu0 }
  0xf1   :  { %v847_v59 = vadd.low.f32.bf16 %v283_v58, %v783_v53  ;;  %v742_v60 = vpop.f32.mrb[2].mxu0 }
  0xf2   :  { %v848_v61 = vadd.high.f32.bf16 %v742_v60, %v788_v54  ;;  %v286_v62 = vpop.f32.mrb[3].mxu0  ;;  %v364_v1 = vmax.f32 %v846_v57, 0.0  ;;  %v567_v54 = vadd.f32 %v566_v52, %v565_v51 }
  0xf3   :  { %v849_v0 = vadd.high.f32.bf16 %v286_v62, %v783_v53  ;;  %v362_v3 = vmax.f32 %v847_v59, 0.0  ;;  %v814_v53 = vpop.permute.xlu0 %813 }
  0xf4   :  { %v365_v2 = vmax.f32 %v848_v61, 0.0  ;;  %v568_v56 = vrot.slane %v567_v54, 4 }
  0xf5   :  { %v363_v4 = vmax.f32 %v849_v0, 0.0 }
  0xf6   :  { %v383_v5 = vpack.c.bf16 %v365_v2, %v364_v1  ;;  %v569_v2 = vadd.f32 %v568_v56, %v567_v54 }
  0xf7   :  { %v745_v6 = vpop.f32.mrb[4].mxu0  ;;  %v382_v7 = vpack.c.bf16 %v363_v4, %v362_v3  ;;  %v824_v59 = vpop.permute.xlu0 %823 }
  0xf8   :  { %v850_v8 = vadd.low.f32.bf16 %v745_v6, %v799_v63  ;;  %v299_v9 = vpop.f32.mrb[5].mxu0  ;;  %v826_v0 = vunpack.i.h.bf16 %v824_v59  ;;  %v825_v1 = vunpack.i.l.bf16 %v824_v59  ;;  %v570_v6 = vrot.slane %v569_v2, 2 }
  0xf9   :  { %v851_v10 = vadd.low.f32.bf16 %v299_v9, %v794_v55  ;;  %v746_v11 = vpop.f32.mrb[6].mxu0  ;;  %747 = vmatprep.subr.bf16.mxu1 %v382_v7 }
  0xfa   :  { %v852_v12 = vadd.high.f32.bf16 %v746_v11, %v799_v63  ;;  %v302_v13 = vpop.f32.mrb[7].mxu0  ;;  %748 = vmatpush3.bf16.msra.mxu1 %v382_v7  ;;  %v368_v15 = vmax.f32 %v850_v8, 0.0  ;;  %v887_v8 = vmov 269488144  }
  0xfb   :  { %v853_v14 = vadd.high.f32.bf16 %v302_v13, %v794_v55  ;;  %749 = vmatprep.subr.bf16.mxu1 %v383_v5  ;;  %v366_v17 = vmax.f32 %v851_v10, 0.0  ;;  %v600_v9 = vunpack.c.l.s4 %v887_v8  ;;  %v602_v10 = vlaneseq }
  0xfc   :  { %v369_v16 = vmax.f32 %v852_v12, 0.0  ;;  %v571_v12 = vadd.f32 %v570_v6, %v569_v2 }
  0xfd   :  { %v367_v18 = vmax.f32 %v853_v14, 0.0  ;;  %v601_v14 = vunpack.c.0.s8 %v600_v9 }
  0xfe   :  { %v385_v19 = vpack.c.bf16 %v369_v16, %v368_v15  ;;  %750 = vmatpush3.bf16.msra.mxu1 %v383_v5  ;;  %v603_v15 = vshrl.u32 %v602_v10, 7 }
  0xff   :  { %v384_v20 = vpack.c.bf16 %v367_v18, %v366_v17  ;;  %v572_v17 = vrot.slane %v571_v12, 1 }
 0x101   :  { %751 = vmatprep.subr.bf16.mxu1 %v384_v20 }
 0x102   :  { %752 = vmatpush3.bf16.msra.mxu1 %v384_v20 }
 0x103   :  { %753 = vmatprep.subr.bf16.mxu1 %v385_v19 }
 0x106   :  { %754 = vmatpush3.bf16.msra.mxu1 %v385_v19  ;;  %v604_v19 = vsub.s32 %v601_v14, %v603_v15 }
 0x107   :  { %759 = vmatprep.subr.bf16.mxu1 %v885_v22 }
 0x109   :  { %756 = vmatmul.mubr.msk.bf16.vlgmr.msra.gmra.mrb[0].mxu1 %vm416_vm1, %v840_v21  ;;  %v597_v21 = vpop.permute.xlu1 %596 }
 0x10a   :  { %763 = vmatprep.mubr.msk.bf16.mxu1 %vm886_vm2, %v885_v22 }
 0x1dc   :  { %v757_v25 = vpop.f32.mrb[0].mxu1 }
 0x1dd   :  { %v854_v26 = vadd.low.f32.bf16 %v757_v25, %v809_v23  ;;  %v457_v27 = vpop.f32.mrb[1].mxu1 }
 0x1de   :  { %v855_v28 = vadd.low.f32.bf16 %v457_v27, %v804_v24  ;;  %v758_v29 = vpop.f32.mrb[2].mxu1 }
 0x1df   :  { %v856_v30 = vadd.high.f32.bf16 %v758_v29, %v809_v23  ;;  %v460_v31 = vpop.f32.mrb[3].mxu1  ;;  %v474_v33 = vmax.f32 %v854_v26, 0.0 }
 0x1e0   :  { %v857_v32 = vadd.high.f32.bf16 %v460_v31, %v804_v24  ;;  %v472_v35 = vmax.f32 %v855_v28, 0.0  ;;  %v605_v24 = vrot.slane %v597_v21, %v604_v19 }
 0x1e1   :  { %v475_v34 = vmax.f32 %v856_v30, 0.0 }
 0x1e2   :  { %v473_v36 = vmax.f32 %v857_v32, 0.0 }
 0x1e3   :  { %v483_v37 = vpack.c.bf16 %v475_v34, %v474_v33 }
 0x1e4   :  { %v482_v38 = vpack.c.bf16 %v473_v36, %v472_v35 }
 0x1e6   :  { %760 = vmatpush3.bf16.msra.mxu1 %v482_v38 }
 0x1e7   :  { %761 = vmatprep.subr.bf16.mxu1 %v885_v22  ;;  %v573_v22 = vadd.f32 %v572_v17, %v571_v12 }
 0x1ea   :  { %762 = vmatpush3.bf16.msra.mxu1 %v483_v37 }
 0x1ed   :  { %764 = vmatmul.mubr.msk.bf16.vlgmr.msra.gmra.mrb[4].mxu1 %vm127_vm0, %v841_v39 }
 0x2c0   :  { %v536_v55 = vpop.f32.mrb[4].mxu1 }
 0x2c1   :  { %v858_v57 = vadd.low.f32.bf16 %v536_v55, %v814_v53  ;;  %v765_v58 = vpop.f32.mrb[5].mxu1 }
 0x2c2   :  { %v539_v60 = vpop.f32.mrb[6].mxu1 }
 0x2c3   :  { %v543_v61 = vmax.f32 %v858_v57, 0.0  ;;  %v859_v62 = vadd.high.f32.bf16 %v539_v60, %v814_v53  ;;  %v766_v63 = vpop.f32.mrb[7].mxu1 }
 0x2c5   :  { %v544_v3 = vmax.f32 %v859_v62, 0.0  ;;  %v584_v4 = vmul.f32 %v825_v1, %v543_v61 }
 0x2c7   :  { %v585_v5 = vmul.f32 %v826_v0, %v544_v3 }
 0x2c9   :  { %v586_v7 = vadd.f32 %v585_v5, %v584_v4 }
 0x2cb   :  { %v587_v11 = vrot.slane %v586_v7, 4 }
 0x2cd   :  { %v588_v13 = vadd.f32 %v587_v11, %v586_v7 }
 0x2cf   :  { %v589_v16 = vrot.slane %v588_v13, 2 }
 0x2d1   :  { %v590_v18 = vadd.f32 %v589_v16, %v588_v13 }
 0x2d3   :  { %v591_v20 = vrot.slane %v590_v18, 1 }
 0x2d5   :  { %v592_v23 = vadd.f32 %v591_v20, %v590_v18 }
 0x2d7   :  { %v593_v25 = vadd.f32 %v592_v23, %v573_v22 }
 0x2d9   :  { %v606_v26 = vadd.f32 %v605_v24, %v593_v25 }
 0x2db   :  { %v607_v27 = vsub.f32 0.0, %v606_v26 }
 0x2dd   :  { %v608_v28 = vmul.f32 1.442695, %v607_v27 }
 0x2df   :  { %842 = vpow2.f32 %v608_v28 }
 0x2e9   :  { %v843_v29 = vpop.eup %842 }
 0x2ea   :  { %v610_v30 = vadd.f32 1.0, %v843_v29 }
 0x2ec   :  { %844 = vrcp.f32 %v610_v30 }
 0x2f6   :  { %v845_v31 = vpop.eup %844 }
 0x2f7   :  { %613 = vst [vmem:[#allocation3] sm:$0x1] %v845_v31 }
 0x2f8   :  { %871 = shalt.err (!%p868_p4)
}
 0x2f9   :  { %s872_s13 = scalar_lea.hbm %s1070_s12, 16 }
 0x2fa   :  { %p873_p5 = scmp.ne.s32.totalorder %s1070_s12, %s872_s13  ;;  %p876_p6 = scmp.lt.u32.totalorder %s872_s13, %s1070_s12 }
 0x2fc   :  { %p878_p7 = pnand %p876_p6, %p873_p5 }
 0x2fe   :  { %881 = shalt.err (!%p878_p7)
}
 0x2ff   :  { %623 = dma.vmem_to_hbm [thread:$0]  %s621_s1, 16, %s1070_s12, [#allocation4]  }
 0x300   :  { %882 = dma.done.wait [#allocation4], 16  }
 0x301   :  { %883 = vsyncadd [#allocation4], 4294967280 }
 0x302   :  { %627 = vsyncpa [#allocation4], 1 }

</bundles_post_ra>
